<compile_context>
chip_gen: v6e
topology: v6e:2x2x1
jax: 0.10.0
libtpu: 0.0.40
codegen_flags: <defaults>
</compile_context>

<pallas_src>
import functools
import math

import jax
import jax.numpy as jnp
from jax import lax
from jax.experimental import pallas as pl
from jax.experimental.pallas import tpu as pltpu


DEFAULT_MASK_VALUE = -1e30  # finite "minus infinity" for in-kernel causal masking


# ----------------------------- helpers -----------------------------

def _tile(dim, target, mult):
    """Largest tile <= target that divides dim and is a multiple of `mult`.
    Falls back to the full dim (always a legal block)."""
    if dim <= target:
        return dim
    t = target
    while t >= mult:
        if dim % t == 0:
            return t
        t //= 2
    return dim


def _head_group(nh, target):
    """Largest divisor of nh that is <= target."""
    g = max(1, min(nh, target))
    while nh % g:
        g -= 1
    return g


def _rotate_half(x):
    half = x.shape[-1] // 2
    return jnp.concatenate([-x[..., half:], x[..., :half]], axis=-1)


def _chip_defaults():
    """Per-generation tile targets and scoped-VMEM limit."""
    try:
        vmem = getattr(pltpu.get_tpu_info(), "vmem_capacity_bytes", None)
    except Exception:
        vmem = None
    if vmem is not None and vmem <= (80 << 20):
        # v7x-class: 64 MiB VMEM per TC -> smaller tiles, keep pipeline headroom.
        return dict(tq=256, tk=256, ts=256, vmem_limit=48 << 20)
    if vmem is not None:
        # v5e/v6e-class: 128 MiB physical; default scoped limit (16/32 MiB) is
        # the binding constraint -> raise it and use bigger tiles.
        return dict(tq=512, tk=512, ts=512, vmem_limit=96 << 20)
    # Unknown backend: conservative tiles, default scoped limit.
    return dict(tq=256, tk=256, ts=256, vmem_limit=None)


# ----------------------------- fused QKV projection -----------------------------

def _qkv_proj_kernel(x_ref, w_ref, o_ref, acc_ref, *, g_h):
    """One (batch, seq-tile, head-group, k-tile) step: acc[h] += x_tile @ w[h]."""
    kk = pl.program_id(3)

    @pl.when(kk == 0)
    def _():
        acc_ref[...] = jnp.zeros(acc_ref.shape, acc_ref.dtype)

    x = x_ref[0]                                     # (ts, tkk)
    for h in range(g_h):                             # static, small -> unrolled
        acc_ref[h] += jnp.dot(x, w_ref[h], preferred_element_type=jnp.float32)

    @pl.when(kk == pl.num_programs(3) - 1)
    def _():
        o_ref[0] = acc_ref[...].astype(o_ref.dtype)


def qkv_proj_pallas(x, w_heads, *, ts_target=256, tk_target=512, hg_target=8,
                    vmem_limit=None):
    """x: (B, S, hid); w_heads: (NH, hid, D) -> (B, NH, S, D) head-major."""
    B, S, hid = x.shape
    NH, _, D = w_heads.shape
    ts = _tile(S, ts_target, 8)
    tkk = _tile(hid, tk_target, 128)
    g_h = _head_group(NH, hg_target)                 # heads per grid step
    grid = (B, S // ts, NH // g_h, hid // tkk)
    kernel = functools.partial(_qkv_proj_kernel, g_h=g_h)
    return pl.pallas_call(
        kernel,
        out_shape=jax.ShapeDtypeStruct((B, NH, S, D), x.dtype),
        grid=grid,
        in_specs=[
            pl.BlockSpec((1, ts, tkk), lambda b, s, hg, k: (b, s, k)),
            pl.BlockSpec((g_h, tkk, D), lambda b, s, hg, k: (hg, k, 0)),
        ],
        out_specs=pl.BlockSpec((1, g_h, ts, D), lambda b, s, hg, k: (b, hg, s, 0)),
        scratch_shapes=[pltpu.VMEM((g_h, ts, D), jnp.float32)],
        compiler_params=pltpu.CompilerParams(
            dimension_semantics=("parallel", "parallel", "parallel", "arbitrary"),
            vmem_limit_bytes=vmem_limit),
    )(x, w_heads)


# ----------------------------- output projection -----------------------------

def _o_proj_kernel(a_ref, w_ref, o_ref, acc_ref):
    """One (batch, seq-tile, out-tile, head) step: acc += attn_head @ wo_head."""
    h = pl.program_id(3)

    @pl.when(h == 0)
    def _():
        acc_ref[...] = jnp.zeros(acc_ref.shape, acc_ref.dtype)

    acc_ref[...] += jnp.dot(a_ref[0, 0], w_ref[0],
                            preferred_element_type=jnp.float32)

    @pl.when(h == pl.num_programs(3) - 1)
    def _():
        o_ref[0] = acc_ref[...].astype(o_ref.dtype)


def o_proj_pallas(attn, wo_heads, *, ts_target=256, acc_budget=8 << 20,
                  vmem_limit=None):
    """attn: (B, H, S, D); wo_heads: (H, D, hid) -> (B, S, hid)."""
    B, H, S, D = attn.shape
    hid = wo_heads.shape[2]
    ts = _tile(S, ts_target, 8)
    # Collapse the hid tiling whenever the f32 accumulator fits comfortably:
    # removes redundant re-reads of each per-head attn s-tile.
    tn = hid if ts * hid * 4 <= acc_budget else _tile(hid, 512, 128)
    grid = (B, S // ts, hid // tn, H)
    return pl.pallas_call(
        _o_proj_kernel,
        out_shape=jax.ShapeDtypeStruct((B, S, hid), attn.dtype),
        grid=grid,
        in_specs=[
            pl.BlockSpec((1, 1, ts, D), lambda b, s, n, h: (b, h, s, 0)),
            pl.BlockSpec((1, D, tn), lambda b, s, n, h: (h, 0, n)),
        ],
        out_specs=pl.BlockSpec((1, ts, tn), lambda b, s, n, h: (b, s, n)),
        scratch_shapes=[pltpu.VMEM((ts, tn), jnp.float32)],
        compiler_params=pltpu.CompilerParams(
            dimension_semantics=("parallel", "parallel", "parallel", "arbitrary"),
            vmem_limit_bytes=vmem_limit),
    )(attn, wo_heads)


# ----------------------------- flash attention (GQA-grouped, q-tiled, kv-blocked) -

def _flash_attn_kernel(*refs, scale, causal, tq, tk):
    if causal:
        (q_ref, k_ref, v_ref, cq_ref, sq_ref, ck_ref, sk_ref,
         o_ref, qr_ref, m_ref, l_ref, acc_ref) = refs
        mask_ref = None
    else:
        (q_ref, k_ref, v_ref, cq_ref, sq_ref, ck_ref, sk_ref, mask_ref,
         o_ref, qr_ref, m_ref, l_ref, acc_ref) = refs

    n_rep, D = q_ref.shape[1], q_ref.shape[3]
    GQ = n_rep * tq
    qi = pl.program_id(2)
    kv = pl.program_id(3)
    q_off = qi * tq
    k_off = kv * tk

    @pl.when(kv == 0)
    def _init():
        # RoPE the query-tile of the whole GQA group once; fold in 1/sqrt(D).
        q = q_ref[0]                                   # (n_rep, tq, D)
        cos = cq_ref[...]                              # (1, tq, D) broadcasts
        sin = sq_ref[...]
        qe = q * cos + _rotate_half(q) * sin
        qr_ref[...] = (qe * scale).reshape(GQ, D).astype(qr_ref.dtype)
        m_ref[...] = jnp.full(m_ref.shape, -jnp.inf, m_ref.dtype)
        l_ref[...] = jnp.zeros(l_ref.shape, l_ref.dtype)
        acc_ref[...] = jnp.zeros(acc_ref.shape, acc_ref.dtype)

    def _update():
        # K/V tile for this step (shared by all n_rep query heads of the group).
        k = k_ref[0, 0]                                # (tk, D)
        v = v_ref[0, 0]                                # (tk, D)
        ke = k * ck_ref[0] + _rotate_half(k) * sk_ref[0]

        # Contract the D axes directly (no ke.T transpose on the XLU).
        s = lax.dot_general(qr_ref[...], ke, (((1,), (1,)), ((), ())),
                            preferred_element_type=jnp.float32)      # (GQ, tk)

        if causal:
            q_pos = q_off + lax.broadcasted_iota(jnp.int32, (tq, tk), 0)
            k_pos = k_off + lax.broadcasted_iota(jnp.int32, (tq, tk), 1)
            mask = jnp.where(k_pos <= q_pos, 0.0,
                             DEFAULT_MASK_VALUE).astype(jnp.float32)
        else:
            mask = mask_ref[0, 0].astype(jnp.float32)                # (tq, tk)
        s = (s.reshape(n_rep, tq, tk) + mask[None]).reshape(GQ, tk)

        m_prev = m_ref[...]
        m_new = jnp.maximum(m_prev, jnp.max(s, axis=-1, keepdims=True))
        alpha = jnp.exp(m_prev - m_new)
        p = jnp.exp(s - m_new)
        l_ref[...] = alpha * l_ref[...] + jnp.sum(p, axis=-1, keepdims=True)
        acc_ref[...] = alpha * acc_ref[...] + jnp.dot(
            p.astype(v.dtype), v, preferred_element_type=jnp.float32)
        m_ref[...] = m_new

    if causal:
        # Skip kv blocks that are entirely in the future of this query tile.
        pl.when(k_off < q_off + tq)(_update)
    else:
        _update()

    @pl.when(kv == pl.num_programs(3) - 1)
    def _finish():
        l = l_ref[...]
        l = jnp.where(l == 0.0, 1.0, l)          # guard fully-masked padding rows
        out = acc_ref[...] * pl.reciprocal(l, approx=True)
        o_ref[...] = out.reshape(1, n_rep, tq, D).astype(o_ref.dtype)


def flash_attention_pallas(p4, cos, sin, mask=None, *, num_q_heads, num_kv_heads,
                           head_dim, causal=False, tq_target=256, tk_target=256,
                           vmem_limit=None):
    """p4: fused head-major q/k/v (B, H + 2*KVH, S, D); cos/sin: (B, S, D).
    If causal=True the mask is generated in-kernel (no HBM mask traffic);
    otherwise `mask` is the additive (B, 1, S, S) mask streamed in (tq, tk) blocks.
    Returns context (B, H, S, D)."""
    B, NH, S, D = p4.shape
    H, KVH = num_q_heads, num_kv_heads
    n_rep = H // KVH
    tq = _tile(S, tq_target, 8)
    tk = _tile(S, tk_target, 128)
    GQ = n_rep * tq
    scale = 1.0 / math.sqrt(head_dim)
    kernel = functools.partial(_flash_attn_kernel, scale=scale, causal=causal,
                               tq=tq, tk=tk)

    in_specs = [
        pl.BlockSpec((1, n_rep, tq, D), lambda b, g, qi, kv: (b, g, qi, 0)),         # Q group tile
        pl.BlockSpec((1, 1, tk, D), lambda b, g, qi, kv: (b, H + g, kv, 0)),         # K head tile
        pl.BlockSpec((1, 1, tk, D), lambda b, g, qi, kv: (b, H + KVH + g, kv, 0)),   # V head tile
        pl.BlockSpec((1, tq, D), lambda b, g, qi, kv: (b, qi, 0)),                   # cos (q rows)
        pl.BlockSpec((1, tq, D), lambda b, g, qi, kv: (b, qi, 0)),                   # sin (q rows)
        pl.BlockSpec((1, tk, D), lambda b, g, qi, kv: (b, kv, 0)),                   # cos (k rows)
        pl.BlockSpec((1, tk, D), lambda b, g, qi, kv: (b, kv, 0)),                   # sin (k rows)
    ]
    args = [p4, p4, p4, cos, sin, cos, sin]
    if not causal:
        assert mask is not None
        in_specs.append(
            pl.BlockSpec((1, 1, tq, tk), lambda b, g, qi, kv: (b, 0, qi, kv)))
        args.append(mask)

    return pl.pallas_call(
        kernel,
        out_shape=jax.ShapeDtypeStruct((B, H, S, D), p4.dtype),
        grid=(B, KVH, S // tq, S // tk),
        in_specs=in_specs,
        out_specs=pl.BlockSpec((1, n_rep, tq, D), lambda b, g, qi, kv: (b, g, qi, 0)),
        scratch_shapes=[
            pltpu.VMEM((GQ, D), p4.dtype),      # rotated + pre-scaled Q tile
            pltpu.VMEM((GQ, 1), jnp.float32),   # running max
            pltpu.VMEM((GQ, 1), jnp.float32),   # running denominator
            pltpu.VMEM((GQ, D), jnp.float32),   # running numerator
        ],
        compiler_params=pltpu.CompilerParams(
            dimension_semantics=("parallel", "parallel", "parallel", "arbitrary"),
            vmem_limit_bytes=vmem_limit),
    )(*args)


# ----------------------------- full attention-weights kernel (optional) -------

def _attn_weights_kernel(q_ref, k_ref, cq_ref, sq_ref, ck_ref, sk_ref,
                         mask_ref, w_ref, *, scale):
    q = q_ref[0, 0]                                   # (tq, D)
    k = k_ref[0, 0]                                   # (S, D)
    qe = (q * cq_ref[0] + _rotate_half(q) * sq_ref[0]) * scale
    ke = k * ck_ref[0] + _rotate_half(k) * sk_ref[0]
    s = lax.dot_general(qe, ke, (((1,), (1,)), ((), ())),
                        preferred_element_type=jnp.float32)          # (tq, S)
    s = s + mask_ref[0, 0].astype(jnp.float32)
    s = s - jnp.max(s, axis=-1, keepdims=True)
    p = jnp.exp(s)
    p = p / jnp.sum(p, axis=-1, keepdims=True)
    w_ref[0, 0] = p.astype(w_ref.dtype)


def attn_weights_pallas(p4, cos, sin, mask, *, num_q_heads, num_kv_heads,
                        head_dim, tq_target=256, vmem_limit=None):
    """Off the hot path: materializes the full (B, H, S, S) softmax weights
    (query-tiled so VMEM stays O(tq*S), not O(S^2))."""
    B, NH, S, D = p4.shape
    H, KVH = num_q_heads, num_kv_heads
    n_rep = H // KVH
    tq = _tile(S, tq_target, 8)
    scale = 1.0 / math.sqrt(head_dim)
    kernel = functools.partial(_attn_weights_kernel, scale=scale)
    return pl.pallas_call(
        kernel,
        out_shape=jax.ShapeDtypeStruct((B, H, S, S), p4.dtype),
        grid=(B, H, S // tq),
        in_specs=[
            pl.BlockSpec((1, 1, tq, D), lambda b, h, qi: (b, h, qi, 0)),
            pl.BlockSpec((1, 1, S, D), lambda b, h, qi: (b, H + h // n_rep, 0, 0)),
            pl.BlockSpec((1, tq, D), lambda b, h, qi: (b, qi, 0)),
            pl.BlockSpec((1, tq, D), lambda b, h, qi: (b, qi, 0)),
            pl.BlockSpec((1, S, D), lambda b, h, qi: (b, 0, 0)),
            pl.BlockSpec((1, S, D), lambda b, h, qi: (b, 0, 0)),
            pl.BlockSpec((1, 1, tq, S), lambda b, h, qi: (b, 0, qi, 0)),
        ],
        out_specs=pl.BlockSpec((1, 1, tq, S), lambda b, h, qi: (b, h, qi, 0)),
        compiler_params=pltpu.CompilerParams(
            dimension_semantics=("parallel", "parallel", "parallel"),
            vmem_limit_bytes=vmem_limit),
    )(p4, p4, cos, sin, cos, sin, mask)


# ----------------------------- module wrapper -----------------------------

class GemmaConfig:
    def __init__(self, hidden_size, num_attention_heads, num_key_value_heads,
                 head_dim, rope_theta=10000.0):
        self.hidden_size = hidden_size
        self.num_attention_heads = num_attention_heads
        self.num_key_value_heads = num_key_value_heads
        self.head_dim = head_dim
        self.rope_theta = rope_theta


class GemmaAttentionPallas:
    """Mirrors GemmaAttention.forward (no bias, dropout=0).

    TODO(synk): KVCache.update (host-side tensor concatenation across decode
    steps) has no in-kernel equivalent here; this covers the single-call
    (prefill) path of the reference module.
    """

    def __init__(self, config: GemmaConfig, key, dtype=jnp.float32):
        self.cfg = config
        self.dtype = dtype
        H, KVH, D, hid = (config.num_attention_heads, config.num_key_value_heads,
                          config.head_dim, config.hidden_size)
        assert hid % H == 0
        assert H % KVH == 0 and D % 2 == 0
        k1, k2, k3, k4 = jax.random.split(key, 4)
        scale = 0.02
        # PyTorch nn.Linear layout: (out_features, in_features).
        self.wq = (jax.random.normal(k1, (H * D, hid), jnp.float32) * scale).astype(dtype)
        self.wk = (jax.random.normal(k2, (KVH * D, hid), jnp.float32) * scale).astype(dtype)
        self.wv = (jax.random.normal(k3, (KVH * D, hid), jnp.float32) * scale).astype(dtype)
        self.wo = (jax.random.normal(k4, (hid, H * D), jnp.float32) * scale).astype(dtype)
        # Fused, head-major projection weight: (H + 2*KVH, hid, D).
        w_all = jnp.concatenate([self.wq, self.wk, self.wv], axis=0)
        nh = H + 2 * KVH
        self.w_qkv_heads = w_all.reshape(nh, D, hid).transpose(0, 2, 1)
        # Per-head output-projection weight: (H, D, hid).
        self.wo_heads = self.wo.T.reshape(H, D, hid)
        self._chip = _chip_defaults()

    def _rotary(self, position_ids, dtype):
        D = self.cfg.head_dim
        inv_freq = 1.0 / (self.cfg.rope_theta **
                          (jnp.arange(0, D, 2, dtype=jnp.float32) / D))
        freqs = position_ids[:, :, None].astype(jnp.float32) * inv_freq[None, None, :]
        emb = jnp.concatenate([freqs, freqs], axis=-1)          # (B, S, D)
        return jnp.cos(emb).astype(dtype), jnp.sin(emb).astype(dtype)

    def __call__(self, hidden_states, attention_mask, position_ids,
                 return_weights=True, assume_causal_mask=False,
                 tq_target=None, tk_target=None, ts_target=None):
        cfg = self.cfg
        chip = self._chip
        tq_t = tq_target or chip["tq"]
        tk_t = tk_target or chip["tk"]
        ts_t = ts_target or chip["ts"]
        vl = chip["vmem_limit"]

        hidden_states = hidden_states.astype(self.dtype)
        B, S, hid = hidden_states.shape
        H, KVH, D = cfg.num_attention_heads, cfg.num_key_value_heads, cfg.head_dim
        assert assume_causal_mask or attention_mask is not None

        # Fused q/k/v projection, head-major output: (B, H + 2*KVH, S, D).
        p4 = qkv_proj_pallas(hidden_states, self.w_qkv_heads,
                             ts_target=ts_t, vmem_limit=vl)

        cos, sin = self._rotary(position_ids, hidden_states.dtype)

        ctx = flash_attention_pallas(
            p4, cos, sin, None if assume_causal_mask else attention_mask,
            num_q_heads=H, num_kv_heads=KVH, head_dim=D,
            causal=assume_causal_mask,
            tq_target=tq_t, tk_target=tk_t, vmem_limit=vl)

        out = o_proj_pallas(ctx, self.wo_heads, ts_target=ts_t, vmem_limit=vl)

        attn_w = None
        if return_weights:
            # Parity with the PyTorch module (which always returns the full
            # (B, H, S, S) weights). Skip on the hot path: it is S^2 HBM traffic.
            assert attention_mask is not None
            attn_w = attn_weights_pallas(p4, cos, sin, attention_mask,
                                         num_q_heads=H, num_kv_heads=KVH,
                                         head_dim=D, tq_target=tq_t,
                                         vmem_limit=vl)
        return out, attn_w


# ----------------------------- pure-JAX reference -----------------------------

def reference_forward(mod: GemmaAttentionPallas, x, mask, position_ids):
    cfg = mod.cfg
    B, S, hid = x.shape
    H, KVH, D = cfg.num_attention_heads, cfg.num_key_value_heads, cfg.head_dim
    n_rep = H // KVH

    x = x.astype(jnp.float32)
    wq = mod.wq.astype(jnp.float32)
    wk = mod.wk.astype(jnp.float32)
    wv = mod.wv.astype(jnp.float32)
    wo = mod.wo.astype(jnp.float32)

    q = (x @ wq.T).reshape(B, S, H, D).transpose(0, 2, 1, 3)
    k = (x @ wk.T).reshape(B, S, KVH, D).transpose(0, 2, 1, 3)
    v = (x @ wv.T).reshape(B, S, KVH, D).transpose(0, 2, 1, 3)

    cos, sin = mod._rotary(position_ids, jnp.float32)
    cos_, sin_ = cos[:, None], sin[:, None]
    q = q * cos_ + _rotate_half(q) * sin_
    k = k * cos_ + _rotate_half(k) * sin_

    k = jnp.repeat(k, n_rep, axis=1)
    v = jnp.repeat(v, n_rep, axis=1)

    scores = jnp.einsum("bhqd,bhkd->bhqk", q, k) / math.sqrt(D) + mask
    w = jax.nn.softmax(scores.astype(jnp.float32), axis=-1)
    o = jnp.einsum("bhqk,bhkd->bhqd", w, v)
    o = o.transpose(0, 2, 1, 3).reshape(B, S, H * D) @ wo.T
    return o, w


def _causal_mask(B, S):
    i = jnp.arange(S)[:, None]
    j = jnp.arange(S)[None, :]
    causal = jnp.where(j <= i, 0.0, -1e9).astype(jnp.float32)
    return jnp.broadcast_to(causal, (B, 1, S, S))


# ----------------------------- main -----------------------------

if __name__ == "__main__":
    root = jax.random.PRNGKey(0)

    # ---- small f32 test (B=2, S=8, hid=32, H=4, KVH=2, D=32) ----
    B, S = 2, 8
    cfg = GemmaConfig(hidden_size=32, num_attention_heads=4,
                      num_key_value_heads=2, head_dim=32)
    k_param, k_x, k_xm = jax.random.split(root, 3)
    mod = GemmaAttentionPallas(cfg, k_param, dtype=jnp.float32)

    x = jax.random.normal(k_x, (B, S, cfg.hidden_size), jnp.float32)
    position_ids = jnp.broadcast_to(jnp.arange(S, dtype=jnp.int32), (B, S))
    attention_mask = _causal_mask(B, S)

    # Hot path: in-kernel causal mask; weights kernel still uses the explicit mask.
    out, attn_w = mod(x, attention_mask, position_ids,
                      return_weights=True, assume_causal_mask=True)
    out = jax.block_until_ready(out)
    attn_w = jax.block_until_ready(attn_w)

    ref_out, ref_w = reference_forward(mod, x, attention_mask, position_ids)
    assert out.shape == (B, S, cfg.hidden_size)
    assert attn_w.shape == (B, cfg.num_attention_heads, S, S)
    assert jnp.allclose(out, ref_out, atol=5e-3, rtol=5e-3), \
        float(jnp.max(jnp.abs(out - ref_out)))
    assert jnp.allclose(attn_w, ref_w, atol=2e-3, rtol=2e-3), \
        float(jnp.max(jnp.abs(attn_w - ref_w)))

    # Explicit streamed additive-mask path (general masks), no weights.
    out_m, none_w = mod(x, attention_mask, position_ids,
                        return_weights=False, assume_causal_mask=False)
    out_m = jax.block_until_ready(out_m)
    assert none_w is None
    assert jnp.allclose(out_m, ref_out, atol=5e-3, rtol=5e-3), \
        float(jnp.max(jnp.abs(out_m - ref_out)))

    # ---- medium f32 test exercising real (8,128) tiling + multi-block grid ----
    B2, S2 = 1, 256
    cfg2 = GemmaConfig(hidden_size=256, num_attention_heads=4,
                       num_key_value_heads=2, head_dim=128)
    k_param2, k_x2 = jax.random.split(k_xm)
    mod2 = GemmaAttentionPallas(cfg2, k_param2, dtype=jnp.float32)
    x2 = jax.random.normal(k_x2, (B2, S2, cfg2.hidden_size), jnp.float32)
    pos2 = jnp.broadcast_to(jnp.arange(S2, dtype=jnp.int32), (B2, S2))
    mask2 = _causal_mask(B2, S2)

    out2, w2 = mod2(x2, mask2, pos2, return_weights=True, assume_causal_mask=True,
                    tq_target=128, tk_target=128, ts_target=128)
    out2 = jax.block_until_ready(out2)
    w2 = jax.block_until_ready(w2)
    ref_out2, ref_w2 = reference_forward(mod2, x2, mask2, pos2)
    assert jnp.allclose(out2, ref_out2, atol=5e-3, rtol=5e-3), \
        float(jnp.max(jnp.abs(out2 - ref_out2)))
    assert jnp.allclose(w2, ref_w2, atol=2e-3, rtol=2e-3), \
        float(jnp.max(jnp.abs(w2 - ref_w2)))

    # ---- bf16 production-dtype smoke test on the medium config ----
    mod2_bf16 = GemmaAttentionPallas(cfg2, k_param2, dtype=jnp.bfloat16)
    out2_bf16, _ = mod2_bf16(x2, mask2, pos2, return_weights=False,
                             assume_causal_mask=True,
                             tq_target=128, tk_target=128, ts_target=128)
    out2_bf16 = jax.block_until_ready(out2_bf16)
    ref_out2_bf16, _ = reference_forward(mod2_bf16, x2, mask2, pos2)
    assert jnp.allclose(out2_bf16.astype(jnp.float32), ref_out2_bf16,
                        atol=3e-2, rtol=5e-2), \
        float(jnp.max(jnp.abs(out2_bf16.astype(jnp.float32) - ref_out2_bf16)))

    print("KERNEL_OK")
</pallas_src>

<mosaic_0001>
module attributes {stable_mosaic.version = 11 : i64} {
  func.func @_qkv_proj_kernel(%arg0: i32, %arg1: i32, %arg2: i32, %arg3: i32, %arg4: memref<1x8x32xf32, #tpu.memory_space<vmem>>, %arg5: memref<8x32x32xf32, #tpu.memory_space<vmem>>, %arg6: memref<1x8x8x32xf32, #tpu.memory_space<vmem>>, %arg7: memref<8x8x32xf32, #tpu.memory_space<vmem>>) attributes {dimension_semantics = [#tpu.dimension_semantics<parallel>, #tpu.dimension_semantics<parallel>, #tpu.dimension_semantics<parallel>, #tpu.dimension_semantics<arbitrary>], iteration_bounds = array<i64: 2, 1, 1, 1>, scalar_prefetch = 0 : i64, scratch_operands = 1 : i64, tpu.core_type = #tpu.core_type<tc>, window_params = [{transform_indices = @transform_0, window_bounds = array<i64: 1, 8, 32>}, {transform_indices = @transform_1, window_bounds = array<i64: 8, 32, 32>}, {transform_indices = @transform_2, window_bounds = array<i64: 1, 8, 8, 32>}]} {
    %c0_i32 = arith.constant 0 : i32
    %0 = arith.cmpi eq, %arg3, %c0_i32 : i32
    %1 = arith.extui %0 : i1 to i32
    %c0_i32_0 = arith.constant 0 : i32
    %2 = arith.cmpi ne, %1, %c0_i32_0 : i32
    scf.if %2 {
      %cst_77 = arith.constant 0.000000e+00 : f32
      %80 = vector.broadcast %cst_77 : f32 to vector<8x8x32xf32>
      %c0_78 = arith.constant 0 : index
      %c0_79 = arith.constant 0 : index
      %c0_80 = arith.constant 0 : index
      %81 = vector.load %arg7[%c0_78, %c0_79, %c0_80] : memref<8x8x32xf32, #tpu.memory_space<vmem>>, vector<8x8x32xf32>
      tpu.vector_store %arg7[%c0_78, %c0_79, %c0_80], %80 {strides = array<i32>} : memref<8x8x32xf32, #tpu.memory_space<vmem>>, vector<8x8x32xf32>,
    } else {
    }
    %c0 = arith.constant 0 : index
    %c0_1 = arith.constant 0 : index
    %c0_2 = arith.constant 0 : index
    %3 = vector.load %arg4[%c0, %c0_1, %c0_2] : memref<1x8x32xf32, #tpu.memory_space<vmem>>, vector<1x8x32xf32>
    %4 = vector.shape_cast %3 : vector<1x8x32xf32> to vector<8x32xf32>
    %c0_3 = arith.constant 0 : index
    %c0_4 = arith.constant 0 : index
    %c0_5 = arith.constant 0 : index
    %5 = vector.load %arg7[%c0_3, %c0_4, %c0_5] : memref<8x8x32xf32, #tpu.memory_space<vmem>>, vector<1x8x32xf32>
    %6 = vector.shape_cast %5 : vector<1x8x32xf32> to vector<8x32xf32>
    %c0_6 = arith.constant 0 : index
    %c0_7 = arith.constant 0 : index
    %c0_8 = arith.constant 0 : index
    %7 = vector.load %arg5[%c0_6, %c0_7, %c0_8] : memref<8x32x32xf32, #tpu.memory_space<vmem>>, vector<1x32x32xf32>
    %8 = vector.shape_cast %7 : vector<1x32x32xf32> to vector<32x32xf32>
    %cst = arith.constant dense<0.000000e+00> : vector<8x32xf32>
    %9 = tpu.matmul %4, %8, %cst {dimension_numbers = #tpu.dot_dimension_numbers<[1], [0], [0], [1], [0, 0, 1, 1], [], []>} : vector<8x32xf32>, vector<32x32xf32>, vector<8x32xf32> -> vector<8x32xf32>
    %10 = arith.addf %6, %9 : vector<8x32xf32>
    %c0_9 = arith.constant 0 : index
    %c0_10 = arith.constant 0 : index
    %c0_11 = arith.constant 0 : index
    %11 = vector.load %arg7[%c0_9, %c0_10, %c0_11] : memref<8x8x32xf32, #tpu.memory_space<vmem>>, vector<1x8x32xf32>
    %12 = vector.shape_cast %11 : vector<1x8x32xf32> to vector<8x32xf32>
    %13 = vector.shape_cast %10 : vector<8x32xf32> to vector<1x8x32xf32>
    tpu.vector_store %arg7[%c0_9, %c0_10, %c0_11], %13 {strides = array<i32>} : memref<8x8x32xf32, #tpu.memory_space<vmem>>, vector<1x8x32xf32>,
    %c1 = arith.constant 1 : index
    %c0_12 = arith.constant 0 : index
    %c0_13 = arith.constant 0 : index
    %14 = vector.load %arg7[%c1, %c0_12, %c0_13] : memref<8x8x32xf32, #tpu.memory_space<vmem>>, vector<1x8x32xf32>
    %15 = vector.shape_cast %14 : vector<1x8x32xf32> to vector<8x32xf32>
    %c1_14 = arith.constant 1 : index
    %c0_15 = arith.constant 0 : index
    %c0_16 = arith.constant 0 : index
    %16 = vector.load %arg5[%c1_14, %c0_15, %c0_16] : memref<8x32x32xf32, #tpu.memory_space<vmem>>, vector<1x32x32xf32>
    %17 = vector.shape_cast %16 : vector<1x32x32xf32> to vector<32x32xf32>
    %cst_17 = arith.constant dense<0.000000e+00> : vector<8x32xf32>
    %18 = tpu.matmul %4, %17, %cst_17 {dimension_numbers = #tpu.dot_dimension_numbers<[1], [0], [0], [1], [0, 0, 1, 1], [], []>} : vector<8x32xf32>, vector<32x32xf32>, vector<8x32xf32> -> vector<8x32xf32>
    %19 = arith.addf %15, %18 : vector<8x32xf32>
    %c1_18 = arith.constant 1 : index
    %c0_19 = arith.constant 0 : index
    %c0_20 = arith.constant 0 : index
    %20 = vector.load %arg7[%c1_18, %c0_19, %c0_20] : memref<8x8x32xf32, #tpu.memory_space<vmem>>, vector<1x8x32xf32>
    %21 = vector.shape_cast %20 : vector<1x8x32xf32> to vector<8x32xf32>
    %22 = vector.shape_cast %19 : vector<8x32xf32> to vector<1x8x32xf32>
    tpu.vector_store %arg7[%c1_18, %c0_19, %c0_20], %22 {strides = array<i32>} : memref<8x8x32xf32, #tpu.memory_space<vmem>>, vector<1x8x32xf32>,
    %c2 = arith.constant 2 : index
    %c0_21 = arith.constant 0 : index
    %c0_22 = arith.constant 0 : index
    %23 = vector.load %arg7[%c2, %c0_21, %c0_22] : memref<8x8x32xf32, #tpu.memory_space<vmem>>, vector<1x8x32xf32>
    %24 = vector.shape_cast %23 : vector<1x8x32xf32> to vector<8x32xf32>
    %c2_23 = arith.constant 2 : index
    %c0_24 = arith.constant 0 : index
    %c0_25 = arith.constant 0 : index
    %25 = vector.load %arg5[%c2_23, %c0_24, %c0_25] : memref<8x32x32xf32, #tpu.memory_space<vmem>>, vector<1x32x32xf32>
    %26 = vector.shape_cast %25 : vector<1x32x32xf32> to vector<32x32xf32>
    %cst_26 = arith.constant dense<0.000000e+00> : vector<8x32xf32>
    %27 = tpu.matmul %4, %26, %cst_26 {dimension_numbers = #tpu.dot_dimension_numbers<[1], [0], [0], [1], [0, 0, 1, 1], [], []>} : vector<8x32xf32>, vector<32x32xf32>, vector<8x32xf32> -> vector<8x32xf32>
    %28 = arith.addf %24, %27 : vector<8x32xf32>
    %c2_27 = arith.constant 2 : index
    %c0_28 = arith.constant 0 : index
    %c0_29 = arith.constant 0 : index
    %29 = vector.load %arg7[%c2_27, %c0_28, %c0_29] : memref<8x8x32xf32, #tpu.memory_space<vmem>>, vector<1x8x32xf32>
    %30 = vector.shape_cast %29 : vector<1x8x32xf32> to vector<8x32xf32>
    %31 = vector.shape_cast %28 : vector<8x32xf32> to vector<1x8x32xf32>
    tpu.vector_store %arg7[%c2_27, %c0_28, %c0_29], %31 {strides = array<i32>} : memref<8x8x32xf32, #tpu.memory_space<vmem>>, vector<1x8x32xf32>,
    %c3 = arith.constant 3 : index
    %c0_30 = arith.constant 0 : index
    %c0_31 = arith.constant 0 : index
    %32 = vector.load %arg7[%c3, %c0_30, %c0_31] : memref<8x8x32xf32, #tpu.memory_space<vmem>>, vector<1x8x32xf32>
    %33 = vector.shape_cast %32 : vector<1x8x32xf32> to vector<8x32xf32>
    %c3_32 = arith.constant 3 : index
    %c0_33 = arith.constant 0 : index
    %c0_34 = arith.constant 0 : index
    %34 = vector.load %arg5[%c3_32, %c0_33, %c0_34] : memref<8x32x32xf32, #tpu.memory_space<vmem>>, vector<1x32x32xf32>
    %35 = vector.shape_cast %34 : vector<1x32x32xf32> to vector<32x32xf32>
    %cst_35 = arith.constant dense<0.000000e+00> : vector<8x32xf32>
    %36 = tpu.matmul %4, %35, %cst_35 {dimension_numbers = #tpu.dot_dimension_numbers<[1], [0], [0], [1], [0, 0, 1, 1], [], []>} : vector<8x32xf32>, vector<32x32xf32>, vector<8x32xf32> -> vector<8x32xf32>
    %37 = arith.addf %33, %36 : vector<8x32xf32>
    %c3_36 = arith.constant 3 : index
    %c0_37 = arith.constant 0 : index
    %c0_38 = arith.constant 0 : index
    %38 = vector.load %arg7[%c3_36, %c0_37, %c0_38] : memref<8x8x32xf32, #tpu.memory_space<vmem>>, vector<1x8x32xf32>
    %39 = vector.shape_cast %38 : vector<1x8x32xf32> to vector<8x32xf32>
    %40 = vector.shape_cast %37 : vector<8x32xf32> to vector<1x8x32xf32>
    tpu.vector_store %arg7[%c3_36, %c0_37, %c0_38], %40 {strides = array<i32>} : memref<8x8x32xf32, #tpu.memory_space<vmem>>, vector<1x8x32xf32>,
    %c4 = arith.constant 4 : index
    %c0_39 = arith.constant 0 : index
    %c0_40 = arith.constant 0 : index
    %41 = vector.load %arg7[%c4, %c0_39, %c0_40] : memref<8x8x32xf32, #tpu.memory_space<vmem>>, vector<1x8x32xf32>
    %42 = vector.shape_cast %41 : vector<1x8x32xf32> to vector<8x32xf32>
    %c4_41 = arith.constant 4 : index
    %c0_42 = arith.constant 0 : index
    %c0_43 = arith.constant 0 : index
    %43 = vector.load %arg5[%c4_41, %c0_42, %c0_43] : memref<8x32x32xf32, #tpu.memory_space<vmem>>, vector<1x32x32xf32>
    %44 = vector.shape_cast %43 : vector<1x32x32xf32> to vector<32x32xf32>
    %cst_44 = arith.constant dense<0.000000e+00> : vector<8x32xf32>
    %45 = tpu.matmul %4, %44, %cst_44 {dimension_numbers = #tpu.dot_dimension_numbers<[1], [0], [0], [1], [0, 0, 1, 1], [], []>} : vector<8x32xf32>, vector<32x32xf32>, vector<8x32xf32> -> vector<8x32xf32>
    %46 = arith.addf %42, %45 : vector<8x32xf32>
    %c4_45 = arith.constant 4 : index
    %c0_46 = arith.constant 0 : index
    %c0_47 = arith.constant 0 : index
    %47 = vector.load %arg7[%c4_45, %c0_46, %c0_47] : memref<8x8x32xf32, #tpu.memory_space<vmem>>, vector<1x8x32xf32>
    %48 = vector.shape_cast %47 : vector<1x8x32xf32> to vector<8x32xf32>
    %49 = vector.shape_cast %46 : vector<8x32xf32> to vector<1x8x32xf32>
    tpu.vector_store %arg7[%c4_45, %c0_46, %c0_47], %49 {strides = array<i32>} : memref<8x8x32xf32, #tpu.memory_space<vmem>>, vector<1x8x32xf32>,
    %c5 = arith.constant 5 : index
    %c0_48 = arith.constant 0 : index
    %c0_49 = arith.constant 0 : index
    %50 = vector.load %arg7[%c5, %c0_48, %c0_49] : memref<8x8x32xf32, #tpu.memory_space<vmem>>, vector<1x8x32xf32>
    %51 = vector.shape_cast %50 : vector<1x8x32xf32> to vector<8x32xf32>
    %c5_50 = arith.constant 5 : index
    %c0_51 = arith.constant 0 : index
    %c0_52 = arith.constant 0 : index
    %52 = vector.load %arg5[%c5_50, %c0_51, %c0_52] : memref<8x32x32xf32, #tpu.memory_space<vmem>>, vector<1x32x32xf32>
    %53 = vector.shape_cast %52 : vector<1x32x32xf32> to vector<32x32xf32>
    %cst_53 = arith.constant dense<0.000000e+00> : vector<8x32xf32>
    %54 = tpu.matmul %4, %53, %cst_53 {dimension_numbers = #tpu.dot_dimension_numbers<[1], [0], [0], [1], [0, 0, 1, 1], [], []>} : vector<8x32xf32>, vector<32x32xf32>, vector<8x32xf32> -> vector<8x32xf32>
    %55 = arith.addf %51, %54 : vector<8x32xf32>
    %c5_54 = arith.constant 5 : index
    %c0_55 = arith.constant 0 : index
    %c0_56 = arith.constant 0 : index
    %56 = vector.load %arg7[%c5_54, %c0_55, %c0_56] : memref<8x8x32xf32, #tpu.memory_space<vmem>>, vector<1x8x32xf32>
    %57 = vector.shape_cast %56 : vector<1x8x32xf32> to vector<8x32xf32>
    %58 = vector.shape_cast %55 : vector<8x32xf32> to vector<1x8x32xf32>
    tpu.vector_store %arg7[%c5_54, %c0_55, %c0_56], %58 {strides = array<i32>} : memref<8x8x32xf32, #tpu.memory_space<vmem>>, vector<1x8x32xf32>,
    %c6 = arith.constant 6 : index
    %c0_57 = arith.constant 0 : index
    %c0_58 = arith.constant 0 : index
    %59 = vector.load %arg7[%c6, %c0_57, %c0_58] : memref<8x8x32xf32, #tpu.memory_space<vmem>>, vector<1x8x32xf32>
    %60 = vector.shape_cast %59 : vector<1x8x32xf32> to vector<8x32xf32>
    %c6_59 = arith.constant 6 : index
    %c0_60 = arith.constant 0 : index
    %c0_61 = arith.constant 0 : index
    %61 = vector.load %arg5[%c6_59, %c0_60, %c0_61] : memref<8x32x32xf32, #tpu.memory_space<vmem>>, vector<1x32x32xf32>
    %62 = vector.shape_cast %61 : vector<1x32x32xf32> to vector<32x32xf32>
    %cst_62 = arith.constant dense<0.000000e+00> : vector<8x32xf32>
    %63 = tpu.matmul %4, %62, %cst_62 {dimension_numbers = #tpu.dot_dimension_numbers<[1], [0], [0], [1], [0, 0, 1, 1], [], []>} : vector<8x32xf32>, vector<32x32xf32>, vector<8x32xf32> -> vector<8x32xf32>
    %64 = arith.addf %60, %63 : vector<8x32xf32>
    %c6_63 = arith.constant 6 : index
    %c0_64 = arith.constant 0 : index
    %c0_65 = arith.constant 0 : index
    %65 = vector.load %arg7[%c6_63, %c0_64, %c0_65] : memref<8x8x32xf32, #tpu.memory_space<vmem>>, vector<1x8x32xf32>
    %66 = vector.shape_cast %65 : vector<1x8x32xf32> to vector<8x32xf32>
    %67 = vector.shape_cast %64 : vector<8x32xf32> to vector<1x8x32xf32>
    tpu.vector_store %arg7[%c6_63, %c0_64, %c0_65], %67 {strides = array<i32>} : memref<8x8x32xf32, #tpu.memory_space<vmem>>, vector<1x8x32xf32>,
    %c7 = arith.constant 7 : index
    %c0_66 = arith.constant 0 : index
    %c0_67 = arith.constant 0 : index
    %68 = vector.load %arg7[%c7, %c0_66, %c0_67] : memref<8x8x32xf32, #tpu.memory_space<vmem>>, vector<1x8x32xf32>
    %69 = vector.shape_cast %68 : vector<1x8x32xf32> to vector<8x32xf32>
    %c7_68 = arith.constant 7 : index
    %c0_69 = arith.constant 0 : index
    %c0_70 = arith.constant 0 : index
    %70 = vector.load %arg5[%c7_68, %c0_69, %c0_70] : memref<8x32x32xf32, #tpu.memory_space<vmem>>, vector<1x32x32xf32>
    %71 = vector.shape_cast %70 : vector<1x32x32xf32> to vector<32x32xf32>
    %cst_71 = arith.constant dense<0.000000e+00> : vector<8x32xf32>
    %72 = tpu.matmul %4, %71, %cst_71 {dimension_numbers = #tpu.dot_dimension_numbers<[1], [0], [0], [1], [0, 0, 1, 1], [], []>} : vector<8x32xf32>, vector<32x32xf32>, vector<8x32xf32> -> vector<8x32xf32>
    %73 = arith.addf %69, %72 : vector<8x32xf32>
    %c7_72 = arith.constant 7 : index
    %c0_73 = arith.constant 0 : index
    %c0_74 = arith.constant 0 : index
    %74 = vector.load %arg7[%c7_72, %c0_73, %c0_74] : memref<8x8x32xf32, #tpu.memory_space<vmem>>, vector<1x8x32xf32>
    %75 = vector.shape_cast %74 : vector<1x8x32xf32> to vector<8x32xf32>
    %76 = vector.shape_cast %73 : vector<8x32xf32> to vector<1x8x32xf32>
    tpu.vector_store %arg7[%c7_72, %c0_73, %c0_74], %76 {strides = array<i32>} : memref<8x8x32xf32, #tpu.memory_space<vmem>>, vector<1x8x32xf32>,
    %c0_i32_75 = arith.constant 0 : i32
    %77 = arith.cmpi eq, %arg3, %c0_i32_75 : i32
    %78 = arith.extui %77 : i1 to i32
    %c0_i32_76 = arith.constant 0 : i32
    %79 = arith.cmpi ne, %78, %c0_i32_76 : i32
    scf.if %79 {
      %c0_77 = arith.constant 0 : index
      %c0_78 = arith.constant 0 : index
      %c0_79 = arith.constant 0 : index
      %80 = vector.load %arg7[%c0_77, %c0_78, %c0_79] : memref<8x8x32xf32, #tpu.memory_space<vmem>>, vector<8x8x32xf32>
      %c0_80 = arith.constant 0 : index
      %c0_81 = arith.constant 0 : index
      %c0_82 = arith.constant 0 : index
      %c0_83 = arith.constant 0 : index
      %81 = vector.load %arg6[%c0_80, %c0_81, %c0_82, %c0_83] : memref<1x8x8x32xf32, #tpu.memory_space<vmem>>, vector<1x8x8x32xf32>
      %82 = vector.shape_cast %81 : vector<1x8x8x32xf32> to vector<8x8x32xf32>
      %83 = vector.shape_cast %80 : vector<8x8x32xf32> to vector<1x8x8x32xf32>
      tpu.vector_store %arg6[%c0_80, %c0_81, %c0_82, %c0_83], %83 {strides = array<i32>} : memref<1x8x8x32xf32, #tpu.memory_space<vmem>>, vector<1x8x8x32xf32>,
    } else {
    }
    return
  }
  func.func @transform_0(%arg0: i32, %arg1: i32, %arg2: i32, %arg3: i32) -> (i32, i32, i32) {
    %c0_i32 = arith.constant 0 : i32
    return %arg0, %arg1, %arg3 : i32, i32, i32
  }
  func.func @transform_1(%arg0: i32, %arg1: i32, %arg2: i32, %arg3: i32) -> (i32, i32, i32) {
    %c0_i32 = arith.constant 0 : i32
    %c0_i32_0 = arith.constant 0 : i32
    return %arg2, %arg3, %c0_i32 : i32, i32, i32
  }
  func.func @transform_2(%arg0: i32, %arg1: i32, %arg2: i32, %arg3: i32) -> (i32, i32, i32, i32) {
    %c0_i32 = arith.constant 0 : i32
    %c0_i32_0 = arith.constant 0 : i32
    return %arg0, %arg2, %arg1, %c0_i32 : i32, i32, i32, i32
  }
}

</mosaic_0001>

<bundles_post_ra>
// kernel: tpu_custom_call.1
= control target key start
LH: loop header
LB: loop body
LE: loop exit
PB: predicated region body
PF: predicated region fallthrough
CT: control target
= control target key end

     0   :  { %7 = vsyncpa [#allocation4], 0  ;;  %s1708_s0 = inlined_call_operand.hbm [shape: f32[2,8,32], index: 0, kind: input, shape index: {}]   ;;  %s1709_s1 = inlined_call_operand.hbm [shape: f32[8,32,32], index: 1, kind: input, shape index: {}]   ;;  %s1710_s2 = inlined_call_operand.hbm [shape: f32[2,8,8,32], index: 2, kind: output, shape index: {}]  }
   0x1   :  { %9 = vsyncpa [#allocation4 + $0x1], 0 }
   0x2   :  { %10 = vsyncpa [#allocation7], 0 }
   0x3   :  { %11 = vsyncpa [#allocation5], 0 }
   0x4   :  { %13 = vsyncpa [#allocation5 + $0x1], 0  ;;  %s1414_s9 = smov 0   ;;  %s1416_s10 = smov 0  }
   0x5   :  { %s1418_s11 = smov 0   ;;  %s1420_s12 = smov 0  }
   0x6   :  { %s1422_s13 = smov 0   ;;  %s1424_s14 = smov 0  }
   0x7 LB: > { %s1018_s15 = sadd.s32 4294967295, %s1388_s14   ;;  %s1019_s16 = sadd.s32 4294967294, %s1388_s14   ;;  %s1388_s14 = sphi %s1424_s14, %s19_s14   ;;  %s1384_s13 = sphi %s1422_s13, %s1728_s13   ;;  %s1380_s12 = sphi %s1420_s12, %s1727_s12   ;;  %s1376_s11 = sphi %s1418_s11, %s1726_s11   ;;  %s1372_s10 = sphi %s1416_s10, %s1725_s10   ;;  %s1368_s9 = sphi %s1414_s9, %s1724_s9  }
   0x8   : > { %p69_p0 = scmp.ne.s32.totalorder %s1372_s10, %s1368_s9  ;;  %p1448_p1 = scmp.eq.s32.totalorder %s1018_s15, 0 }
   0x9   : > { %p1452_p2 = scmp.eq.s32.totalorder %s1018_s15, 1  ;;  %p131_p3 = scmp.eq.s32.totalorder %s1019_s16, 1 }
   0xa   : > { %p1458_p4 = por %p1448_p1, %p69_p0  ;;  %p1020_p5 = scmp.ge.s32.totalorder %s1388_s14, 1 }
   0xb   : > { %p1463_p6 = por %p131_p3, %p69_p0  ;;  %p138_p7 = scmp.lt.s32.totalorder %s1388_s14, 3 }
   0xc   : > { %s1714_s19 = scalar_select %p1458_p4, 1, 0 }
   0xd   : > { %s1715_s20 = scalar_select %p1463_p6, 1, 0 }
   0xe   : > { %p1468_p8 = pnand %p1020_p5, %p138_p7  ;;  %s1390_s22 = smov [#allocation6]  }
   0xf   : > { %s156_s23 = sshll.u32 %s1390_s22, 4  ;;  %s45_s25 = sadd.s32 1, %s1384_s13  ;;  %s157_s23 = int_to_ptr.vmem [resolvable:$true] %s156_s23 }
  0x10   : > { %p1179_p9 = pneg %p1468_p8  ;;  %s1261_s26 = scalar_lea.vmem %s157_s23, 4096 }
  0x11   : > { %p1262_p13 = scmp.ne.s32.totalorder %s157_s23, %s1261_s26  ;;  %p1269_p5 = scmp.lt.s32.totalorder %s157_s23, %s157_s23 }
  0x12   : > { %p1477_p11 = pnand %p1179_p9, %p1448_p1  ;;  %p1270_p7 = scmp.lt.s32.totalorder %s1261_s26, %s1261_s26 }
  0x14   : > { %p1252_p12 = pneg %p1477_p11  ;;  %p1271_p6 = por %p1270_p7, %p1269_p5 }
  0x16   : > { %p1264_p0 = pnand %p1262_p13, %p1252_p12 }
  0x18   : > { %p1265_p3 = pneg %p1264_p0 }
  0x1a   : > { %p1272_p4 = pnand %p1271_p6, %p1265_p3 }
  0x1c   : > { %1275 = shalt.err (!%p1272_p4)
}
  0x1d   : > { %s1391_s27 = smov 128   ;;  %s1392_s28 = smov 8  }
  0x1e   : > { %1182 = dma.hbm_to_vmem [thread:$0]  (!%p1477_p11), %s1709_s1, 4096, %s157_s23, [#allocation7], %s1391_s27, %s1391_s27, %s1392_s28  }
  0x1f   : > { %p47_p6 = scmp.ge.s32.totalorder %s45_s25, 2  ;;  %s56_s3 = sadd.s32 1, %s1376_s11 }
  0x20   : > { %p63_p4 = scmp.ne.s32.totalorder %s1376_s11, %s1372_s10  ;;  %p64_p9 = scmp.eq.s32.totalorder %s1388_s14, 0 }
  0x21   : > { %s1730_s25 = smov (%p47_p6, %s45_s25), 0  ;;  %p1192_p0 = scmp.lt.s32.totalorder %s1388_s14, 2 }
  0x22   : > { %p1495_p12 = por %p64_p9, %p63_p4  ;;  %p1501_p13 = por %p1452_p2, %p63_p4 }
  0x23   : > { %s49_s6 = ssub.s32 %s1384_s13, %s1730_s25  ;;  %s170_s7 = sand.u32 1, %s1376_s11  }
  0x24   : > { %p54_p11 = scmp.eq.s32.totalorder %s49_s6, 0  ;;  %s1023_s8 = sshll.u32 %s170_s7, 3 }
  0x25   : > { %s1024_s16 = sshll.u32 %s1384_s13, 7  ;;  %s174_s26 = scalar_lea.vmem [#allocation3], %s1023_s8 }
  0x26   : > { %s1510_s15 = scalar_select %p54_p11, %s1376_s11, %s56_s3  }
  0x27   : > { %s181_s24 = scalar_lea.hbm %s1708_s0, %s1024_s16  ;;  %s183_s27 = sshll.u32 %s174_s26, 4  ;;  %s184_s27 = int_to_ptr.vmem [resolvable:$true] %s183_s27 }
  0x28   : > { %p1518_p2 = pnand %p1192_p0, %p1495_p12  ;;  %s171_s28 = scalar_lea.sflag [#allocation4], %s170_s7 }
  0x29   : > { %s1289_s29 = scalar_lea.vmem %s184_s27, 128  ;;  %s1393_s30 = smov [#allocation3]  }
  0x2a   : > { %p1278_p3 = pneg %p1518_p2  ;;  %p1290_p5 = scmp.ne.s32.totalorder %s184_s27, %s1289_s29 }
  0x2b   : > { %s1294_s3 = sshll.u32 %s1393_s30, 4  ;;  %s1295_s3 = int_to_ptr.vmem [resolvable:$false] %s1294_s3 }
  0x2c   : > { %p1292_p7 = pnand %p1290_p5, %p1278_p3  ;;  %s1296_s6 = scalar_lea.vmem %s1295_s3, 256 }
  0x2d   : > { %p1297_p4 = scmp.lt.s32.totalorder %s184_s27, %s1295_s3  ;;  %p1298_p9 = scmp.lt.s32.totalorder %s1296_s6, %s1289_s29 }
  0x2e   : > { %p1293_p6 = pneg %p1292_p7 }
  0x2f   : > { %p1299_p11 = por %p1298_p9, %p1297_p4 }
  0x31   : > { %p1300_p10 = pnand %p1299_p11, %p1293_p6 }
  0x33   : > { %1303 = shalt.err (!%p1300_p10)
}
  0x34   : > { %1186 = dma.hbm_to_vmem [thread:$0]  (!%p1518_p2), %s181_s24, 128, %s184_s27, %s171_s28  }
  0x35   : > { %192 = sbr.rel (%p1468_p8) target bundleno = 318 (0x13e), region = 28  ;;  %s1529_s4 = sand.u32 (!%p1468_p8), 1, %s1372_s10  }
  0x36   : > { %s1026_s7 = sshll.u32 (!%p1468_p8), %s1529_s4, 3  ;;  %s195_s8 = scalar_lea.sflag (!%p1468_p8), [#allocation4], %s1529_s4 }
  0x37   : > { %s1533_s16 = scalar_lea.vmem (!%p1468_p8), [#allocation3], %s1026_s7  ;;  %p1721_p12 = scmp.ne.s32.totalorder (!%p1468_p8), %s1714_s19, 0 }
  0x3a   : > { %1355 = dma.done.wait (%p1721_p12), %s195_s8, 128  }
  0x3b   : > { %1357 = vsyncadd (%p1721_p12), %s195_s8, 4294967168 }
  0x3c   : > { %1359 = dma.done.wait (%p1448_p1), [#allocation7], 4096  }
  0x3d   : > { %1361 = vsyncadd (%p1448_p1), [#allocation7], 4294963200  ;;  %vm230_vm0 = vcmask 261120   ;;  %v1394_v0 = vmov 0.0   ;;  %vm1395_vm1 = vmmov 0   ;;  %v244_v1 = vld [vmem:[#allocation6 + $0x18] sm:$0xff] }
  0x3e   : > { %1083 = vmatprep.subr.mxu0 %v1394_v0  ;;  %1094 = vmatprep.subr.mxu1 %v1394_v0  ;;  %231 = vst.msk [vmem:[#allocation2] sm:$0xff] %vm230_vm0, %v1394_v0  ;;  %232 = vst.msk [vmem:[#allocation2 + $0x8] sm:$0xff] %vm230_vm0, %v1394_v0  ;;  %v327_v2 = vld [vmem:[#allocation6 + $0x38] sm:$0xff]  ;;  %v243_v3 = vld [vmem:[#allocation6 + $0x10] sm:$0xff]  ;;  %s1028_s17 = sshll.u32 %s1529_s4, 6  ;;  %s1042_s21 = sshll.u32 %s1380_s12, 10 }
  0x3f   : > { %233 = vst.msk [vmem:[#allocation2 + $0x10] sm:$0xff] %vm230_vm0, %v1394_v0  ;;  %234 = vst.msk [vmem:[#allocation2 + $0x18] sm:$0xff] %vm230_vm0, %v1394_v0  ;;  %1091 = vmatprep.mubr.msk.f32.mxu0 %vm1395_vm1, %v1394_v0  ;;  %1102 = vmatprep.mubr.msk.f32.mxu1 %vm1395_vm1, %v1394_v0  ;;  %v326_v4 = vld [vmem:[#allocation6 + $0x30] sm:$0xff]  ;;  %v242_v5 = vld [vmem:[#allocation6 + $0x8] sm:$0xff]  ;;  %s1629_s19 = scalar_lea.vmem [#allocation8], %s1028_s17  ;;  %s1654_s26 = scalar_lea.hbm %s1710_s2, %s1042_s21 }
  0x40   : > { %235 = vst.msk [vmem:[#allocation2 + $0x20] sm:$0xff] %vm230_vm0, %v1394_v0  ;;  %236 = vst.msk [vmem:[#allocation2 + $0x28] sm:$0xff] %vm230_vm0, %v1394_v0  ;;  %1084 = vmatpush3.msra.mxu0 %v244_v1  ;;  %1095 = vmatpush3.msra.mxu1 %v327_v2  ;;  %v325_v6 = vld [vmem:[#allocation6 + $0x28] sm:$0xff]  ;;  %v241_v7 = vld [vmem:[#allocation6] sm:$0xff]  ;;  %s910_s22 = sshll.u32 %s1629_s19, 4  ;;  %s894_s27 = scalar_lea.sflag [#allocation5], %s1529_s4  ;;  %s1656_s22 = int_to_ptr.vmem [resolvable:$true] %s910_s22 }
  0x41   : > { %237 = vst.msk [vmem:[#allocation2 + $0x30] sm:$0xff] %vm230_vm0, %v1394_v0  ;;  %238 = vst.msk [vmem:[#allocation2 + $0x38] sm:$0xff] %vm230_vm0, %v1394_v0  ;;  %1085 = vmatprep.subr.mxu0 %v1394_v0  ;;  %1096 = vmatprep.subr.mxu1 %v1394_v0  ;;  %v324_v8 = vld [vmem:[#allocation6 + $0x20] sm:$0xff]  ;;  %v1570_v9 = vld [vmem:[%s1533_s16] sm:$0xff]  ;;  %s1304_s18 = scalar_lea.vmem %s1656_s22, 1024  ;;  %s1396_s12 = smov [#allocation8]  }
  0x42   : > { %1086 = vmatpush3.msra.mxu0 %v243_v3  ;;  %1097 = vmatpush3.msra.mxu1 %v326_v4  ;;  %v406_v10 = vld [vmem:[#allocation6 + $0x58] sm:$0xff]  ;;  %v405_v12 = vld [vmem:[#allocation6 + $0x50] sm:$0xff]  ;;  %v404_v14 = vld [vmem:[#allocation6 + $0x48] sm:$0xff]  ;;  %p1305_p1 = scmp.ne.s32.totalorder %s1656_s22, %s1304_s18  ;;  %s1308_s28 = sshll.u32 %s1396_s12, 4  ;;  %s1309_s28 = int_to_ptr.vmem [resolvable:$false] %s1308_s28 }
  0x43   : > { %1087 = vmatprep.subr.mxu0 %v1394_v0  ;;  %1098 = vmatprep.subr.mxu1 %v1394_v0  ;;  %v485_v11 = vld [vmem:[#allocation6 + $0x78] sm:$0xff]  ;;  %v484_v13 = vld [vmem:[#allocation6 + $0x70] sm:$0xff]  ;;  %v483_v15 = vld [vmem:[#allocation6 + $0x68] sm:$0xff]  ;;  %s1310_s29 = scalar_lea.vmem %s1309_s28, 2048  ;;  %p1311_p0 = scmp.lt.s32.totalorder %s1656_s22, %s1309_s28 }
  0x44   : > { %1088 = vmatpush3.msra.mxu0 %v242_v5  ;;  %1099 = vmatpush3.msra.mxu1 %v325_v6  ;;  %v403_v16 = vld [vmem:[#allocation6 + $0x40] sm:$0xff]  ;;  %v564_v18 = vld [vmem:[#allocation6 + $0x98] sm:$0xff]  ;;  %v563_v20 = vld [vmem:[#allocation6 + $0x90] sm:$0xff]  ;;  %p1306_p8 = pnand %p1305_p1, %p1501_p13  ;;  %p1312_p2 = scmp.lt.s32.totalorder %s1310_s29, %s1304_s18 }
  0x45   : > { %1089 = vmatprep.subr.mxu0 %v1394_v0  ;;  %1100 = vmatprep.subr.mxu1 %v1394_v0  ;;  %v482_v17 = vld [vmem:[#allocation6 + $0x60] sm:$0xff]  ;;  %v643_v19 = vld [vmem:[#allocation6 + $0xb8] sm:$0xff]  ;;  %v642_v21 = vld [vmem:[#allocation6 + $0xb0] sm:$0xff] }
  0x46   : > { %1090 = vmatpush3.msra.mxu0 %v241_v7  ;;  %1101 = vmatpush3.msra.mxu1 %v324_v8  ;;  %v562_v22 = vld [vmem:[#allocation6 + $0x88] sm:$0xff]  ;;  %v561_v24 = vld [vmem:[#allocation6 + $0x80] sm:$0xff]  ;;  %v722_v26 = vld [vmem:[#allocation6 + $0xd8] sm:$0xff]  ;;  %p1307_p10 = pneg %p1306_p8  ;;  %p1313_p3 = por %p1312_p2, %p1311_p0 }
  0x47   : > { %1092 = vmatmul.mubr.msk.f32.vlgmr.msra.gmra.mxu0 %vm230_vm0, %v1570_v9  ;;  %1103 = vmatmul.mubr.msk.f32.vlgmr.msra.gmra.mxu1 %vm230_vm0, %v1570_v9  ;;  %v641_v23 = vld [vmem:[#allocation6 + $0xa8] sm:$0xff]  ;;  %v640_v25 = vld [vmem:[#allocation6 + $0xa0] sm:$0xff]  ;;  %v801_v27 = vld [vmem:[#allocation6 + $0xf8] sm:$0xff] }
  0x48   : > { %1105 = vmatprep.subr.mxu0 %v1394_v0  ;;  %1116 = vmatprep.subr.mxu1 %v1394_v0  ;;  %v721_v28 = vld [vmem:[#allocation6 + $0xd0] sm:$0xff]  ;;  %v720_v30 = vld [vmem:[#allocation6 + $0xc8] sm:$0xff]  ;;  %v719_v32 = vld [vmem:[#allocation6 + $0xc0] sm:$0xff]  ;;  %p1314_p5 = pnand %p1313_p3, %p1307_p10 }
  0x49   : > { %1106 = vmatpush3.msra.mxu0 %v406_v10  ;;  %1117 = vmatpush3.msra.mxu1 %v485_v11  ;;  %v800_v29 = vld [vmem:[#allocation6 + $0xf0] sm:$0xff]  ;;  %v799_v31 = vld [vmem:[#allocation6 + $0xe8] sm:$0xff]  ;;  %v798_v33 = vld [vmem:[#allocation6 + $0xe0] sm:$0xff] }
  0x4a   : > { %1107 = vmatprep.subr.mxu0 %v1394_v0  ;;  %1118 = vmatprep.subr.mxu1 %v1394_v0  ;;  %v240_v34 = vld [vmem:[#allocation2] sm:$0xff]  ;;  %v322_v35 = vld [vmem:[#allocation2 + $0x8] sm:$0xff]  ;;  %v401_v42 = vld [vmem:[#allocation2 + $0x10] sm:$0xff] }
  0x4b   : > { %1108 = vmatpush3.msra.mxu0 %v405_v12  ;;  %1119 = vmatpush3.msra.mxu1 %v484_v13  ;;  %v480_v43 = vld [vmem:[#allocation2 + $0x18] sm:$0xff]  ;;  %v559_v52 = vld [vmem:[#allocation2 + $0x20] sm:$0xff]  ;;  %v638_v53 = vld [vmem:[#allocation2 + $0x28] sm:$0xff] }
  0x4c   : > { %1109 = vmatprep.subr.mxu0 %v1394_v0  ;;  %1120 = vmatprep.subr.mxu1 %v1394_v0  ;;  %v717_v62 = vld [vmem:[#allocation2 + $0x30] sm:$0xff]  ;;  %v796_v63 = vld [vmem:[#allocation2 + $0x38] sm:$0xff] }
  0x4d   : > { %1110 = vmatpush3.msra.mxu0 %v404_v14  ;;  %1121 = vmatpush3.msra.mxu1 %v483_v15 }
  0x4e   : > { %1111 = vmatprep.subr.mxu0 %v1394_v0  ;;  %1122 = vmatprep.subr.mxu1 %v1394_v0 }
  0x4f   : > { %1112 = vmatpush3.msra.mxu0 %v403_v16  ;;  %1113 = vmatprep.mubr.msk.f32.mxu0 %vm1395_vm1, %v1394_v0 }
  0x50   : > { %1123 = vmatpush3.msra.mxu1 %v482_v17  ;;  %1124 = vmatprep.mubr.msk.f32.mxu1 %vm1395_vm1, %v1394_v0 }
  0x51   : > { %1114 = vmatmul.mubr.msk.f32.vlgmr.msra.gmra.mxu0 %vm230_vm0, %v1570_v9  ;;  %1125 = vmatmul.mubr.msk.f32.vlgmr.msra.gmra.mxu1 %vm230_vm0, %v1570_v9 }
  0x52   : > { %1127 = vmatprep.subr.mxu0 %v1394_v0  ;;  %1138 = vmatprep.subr.mxu1 %v1394_v0 }
  0x53   : > { %1128 = vmatpush3.msra.mxu0 %v564_v18  ;;  %1139 = vmatpush3.msra.mxu1 %v643_v19 }
  0x54   : > { %1129 = vmatprep.subr.mxu0 %v1394_v0  ;;  %1140 = vmatprep.subr.mxu1 %v1394_v0 }
  0x55   : > { %1130 = vmatpush3.msra.mxu0 %v563_v20  ;;  %1141 = vmatpush3.msra.mxu1 %v642_v21 }
  0x56   : > { %1131 = vmatprep.subr.mxu0 %v1394_v0  ;;  %1142 = vmatprep.subr.mxu1 %v1394_v0 }
  0x57   : > { %1132 = vmatpush3.msra.mxu0 %v562_v22  ;;  %1143 = vmatpush3.msra.mxu1 %v641_v23 }
  0x58   : > { %1133 = vmatprep.subr.mxu0 %v1394_v0  ;;  %1144 = vmatprep.subr.mxu1 %v1394_v0 }
  0x59   : > { %1134 = vmatpush3.msra.mxu0 %v561_v24  ;;  %1135 = vmatprep.mubr.msk.f32.mxu0 %vm1395_vm1, %v1394_v0 }
  0x5a   : > { %1145 = vmatpush3.msra.mxu1 %v640_v25  ;;  %1146 = vmatprep.mubr.msk.f32.mxu1 %vm1395_vm1, %v1394_v0 }
  0x5b   : > { %1136 = vmatmul.mubr.msk.f32.vlgmr.msra.gmra.mxu0 %vm230_vm0, %v1570_v9  ;;  %1147 = vmatmul.mubr.msk.f32.vlgmr.msra.gmra.mxu1 %vm230_vm0, %v1570_v9 }
  0x5c   : > { %1149 = vmatprep.subr.mxu0 %v1394_v0  ;;  %1160 = vmatprep.subr.mxu1 %v1394_v0 }
  0x5d   : > { %1150 = vmatpush3.msra.mxu0 %v722_v26  ;;  %1161 = vmatpush3.msra.mxu1 %v801_v27 }
  0x5e   : > { %1151 = vmatprep.subr.mxu0 %v1394_v0  ;;  %1162 = vmatprep.subr.mxu1 %v1394_v0 }
  0x5f   : > { %1152 = vmatpush3.msra.mxu0 %v721_v28  ;;  %1163 = vmatpush3.msra.mxu1 %v800_v29 }
  0x60   : > { %1153 = vmatprep.subr.mxu0 %v1394_v0  ;;  %1164 = vmatprep.subr.mxu1 %v1394_v0 }
  0x61   : > { %1154 = vmatpush3.msra.mxu0 %v720_v30  ;;  %1165 = vmatpush3.msra.mxu1 %v799_v31 }
  0x62   : > { %1155 = vmatprep.subr.mxu0 %v1394_v0  ;;  %1166 = vmatprep.subr.mxu1 %v1394_v0 }
  0x63   : > { %1156 = vmatpush3.msra.mxu0 %v719_v32  ;;  %1157 = vmatprep.mubr.msk.f32.mxu0 %vm1395_vm1, %v1394_v0 }
  0x64   : > { %1167 = vmatpush3.msra.mxu1 %v798_v33  ;;  %1168 = vmatprep.mubr.msk.f32.mxu1 %vm1395_vm1, %v1394_v0 }
  0x65   : > { %1158 = vmatmul.mubr.msk.f32.vlgmr.msra.gmra.mxu0 %vm230_vm0, %v1570_v9  ;;  %1169 = vmatmul.mubr.msk.f32.vlgmr.msra.gmra.mxu1 %vm230_vm0, %v1570_v9 }
 0x107   : > { %v315_v36 = vpop.f32.mrf.mxu0  ;;  %v394_v37 = vpop.f32.mrf.mxu1 }
 0x108   : > { %v319_v38 = vadd.f32 %v315_v36, %v240_v34  ;;  %v398_v39 = vadd.f32 %v394_v37, %v322_v35 }
 0x109   : > { %v1093_v40 = vpop.f32.mrf.mxu0  ;;  %v1104_v41 = vpop.f32.mrf.mxu1 }
 0x10a   : > { %320 = vst.msk [vmem:[#allocation2] sm:$0xff] %vm230_vm0, %v319_v38  ;;  %399 = vst.msk [vmem:[#allocation2 + $0x8] sm:$0xff] %vm230_vm0, %v398_v39 }
 0x111   : > { %v877_v44 = vld [vmem:[#allocation2] sm:$0xff]  ;;  %v878_v45 = vld [vmem:[#allocation2 + $0x8] sm:$0xff]  ;;  %v473_v46 = vpop.f32.mrf.mxu0  ;;  %v552_v47 = vpop.f32.mrf.mxu1 }
 0x112   : > { %885 = vst.msk [vmem:[%s1629_s19] sm:$0xff] %vm230_vm0, %v877_v44  ;;  %886 = vst.msk [vmem:[%s1629_s19 + $0x8] sm:$0xff] %vm230_vm0, %v878_v45  ;;  %v477_v48 = vadd.f32 %v473_v46, %v401_v42  ;;  %v556_v49 = vadd.f32 %v552_v47, %v480_v43 }
 0x113   : > { %v1115_v50 = vpop.f32.mrf.mxu0  ;;  %v1126_v51 = vpop.f32.mrf.mxu1 }
 0x114   : > { %478 = vst.msk [vmem:[#allocation2 + $0x10] sm:$0xff] %vm230_vm0, %v477_v48  ;;  %557 = vst.msk [vmem:[#allocation2 + $0x18] sm:$0xff] %vm230_vm0, %v556_v49 }
 0x11b   : > { %v879_v54 = vld [vmem:[#allocation2 + $0x10] sm:$0xff]  ;;  %v880_v55 = vld [vmem:[#allocation2 + $0x18] sm:$0xff]  ;;  %v631_v56 = vpop.f32.mrf.mxu0  ;;  %v710_v57 = vpop.f32.mrf.mxu1 }
 0x11c   : > { %887 = vst.msk [vmem:[%s1629_s19 + $0x10] sm:$0xff] %vm230_vm0, %v879_v54  ;;  %888 = vst.msk [vmem:[%s1629_s19 + $0x18] sm:$0xff] %vm230_vm0, %v880_v55  ;;  %v635_v58 = vadd.f32 %v631_v56, %v559_v52  ;;  %v714_v59 = vadd.f32 %v710_v57, %v638_v53 }
 0x11d   : > { %v1137_v60 = vpop.f32.mrf.mxu0  ;;  %v1148_v61 = vpop.f32.mrf.mxu1 }
 0x11e   : > { %636 = vst.msk [vmem:[#allocation2 + $0x20] sm:$0xff] %vm230_vm0, %v635_v58  ;;  %715 = vst.msk [vmem:[#allocation2 + $0x28] sm:$0xff] %vm230_vm0, %v714_v59 }
 0x125   : > { %v881_v0 = vld [vmem:[#allocation2 + $0x20] sm:$0xff]  ;;  %v882_v1 = vld [vmem:[#allocation2 + $0x28] sm:$0xff]  ;;  %v789_v2 = vpop.f32.mrf.mxu0  ;;  %v868_v3 = vpop.f32.mrf.mxu1 }
 0x126   : > { %889 = vst.msk [vmem:[%s1629_s19 + $0x20] sm:$0xff] %vm230_vm0, %v881_v0  ;;  %890 = vst.msk [vmem:[%s1629_s19 + $0x28] sm:$0xff] %vm230_vm0, %v882_v1  ;;  %v793_v4 = vadd.f32 %v789_v2, %v717_v62  ;;  %v872_v5 = vadd.f32 %v868_v3, %v796_v63 }
 0x127   : > { %v1159_v6 = vpop.f32.mrf.mxu0  ;;  %v1170_v7 = vpop.f32.mrf.mxu1 }
 0x128   : > { %794 = vst.msk [vmem:[#allocation2 + $0x30] sm:$0xff] %vm230_vm0, %v793_v4  ;;  %873 = vst.msk [vmem:[#allocation2 + $0x38] sm:$0xff] %vm230_vm0, %v872_v5 }
 0x12f   : > { %v883_v8 = vld [vmem:[#allocation2 + $0x30] sm:$0xff]  ;;  %v884_v9 = vld [vmem:[#allocation2 + $0x38] sm:$0xff] }
 0x130   : > { %891 = vst.msk [vmem:[%s1629_s19 + $0x30] sm:$0xff] %vm230_vm0, %v883_v8  ;;  %892 = vst.msk [vmem:[%s1629_s19 + $0x38] sm:$0xff] %vm230_vm0, %v884_v9 }
 0x131   : > { %1317 = shalt.err (!%p1314_p5)
}
 0x132   : > { %s1318_s30 = scalar_lea.hbm %s1654_s26, 1024  ;;  %s1322_s7 = scalar_lea.hbm %s1710_s2, 2048 }
 0x133   : > { %p1319_p7 = scmp.ne.s32.totalorder %s1654_s26, %s1318_s30  ;;  %p1323_p9 = scmp.lt.s32.totalorder %s1654_s26, %s1710_s2 }
 0x134   : > { %p1324_p11 = scmp.lt.s32.totalorder %s1322_s7, %s1318_s30 }
 0x135   : > { %p1320_p6 = pnand %p1319_p7, %p1501_p13 }
 0x136   : > { %p1325_p12 = por %p1324_p11, %p1323_p9 }
 0x137   : > { %p1321_p4 = pneg %p1320_p6 }
 0x139   : > { %p1326_p1 = pnand %p1325_p12, %p1321_p4 }
 0x13b   : > { %1329 = shalt.err (!%p1326_p1)
}
 0x13c   : > { %s1397_s17 = smov 128   ;;  %s1398_s19 = smov 8  }
 0x13d   : > { %1177 = dma.vmem_to_hbm [thread:$0]  (%p1501_p13), %s1656_s22, 1024, %s1654_s26, %s894_s27, %s1397_s17, %s1397_s17, %s1398_s19  }
 0x13e PF: > { %s925_s21 = sand.u32 1, %s1368_s9   ;;  %p1722_p8 = scmp.ne.s32.totalorder %s1715_s20, 0 }
 0x13f   : > { %p1723_p10 = scmp.ge.s32.totalorder %s1388_s14, 2  ;;  %s926_s23 = scalar_lea.sflag [#allocation5], %s925_s21 }
 0x141   : > { %p1188_p0 = pnand %p1723_p10, %p1722_p8 }
 0x143   : > { %p1189_p2 = pneg %p1188_p0 }
 0x145   : > { %1363 = dma.done.wait (%p1189_p2), %s926_s23, 1024  }
 0x146   : > { %1365 = vsyncadd (%p1189_p2), %s926_s23, 4294966272  ;;  %s19_s14 = sadd.s32 1, %s1388_s14   ;;  %s1724_s9 = smov %s1372_s10 }
 0x147   : > { %p16_p3 = scmp.ge.s32.totalorder %s19_s14, 4   ;;  %s1725_s10 = smov %s1376_s11 }
 0x148   : > { %s1726_s11 = smov %s1510_s15  ;;  %s1727_s12 = smov %s1384_s13 }
 0x149   : > { %s1728_s13 = smov %s1730_s25  ;;  %18 = sbr.rel (!%p16_p3) target bundleno = 7 (0x7), region = 100 }
 0x14e   :  { %931 = vsyncpa [#allocation4], 1 }
 0x14f   :  { %933 = vsyncpa [#allocation4 + $0x1], 1 }
 0x150   :  { %934 = vsyncpa [#allocation7], 1 }
 0x151   :  { %935 = vsyncpa [#allocation5], 1 }
 0x152   :  { %937 = vsyncpa [#allocation5 + $0x1], 1 }

</bundles_post_ra>
